<compile_context>
chip_gen: v6e
topology: v6e:2x2x1
jax: 0.10.0
libtpu: 0.0.40
codegen_flags: <defaults>
</compile_context>

<pallas_src>
import jax
import jax.numpy as jnp
from jax.experimental import pallas as pl
from jax.experimental.pallas import tpu as pltpu

_LANE = 128  # lane width; output tile is emitted lane-dense, wrapper slices column 0


def _disc_kernel(x_ref, lab_ref, w1_ref, folded_ref, w2_ref, o_ref):
    # x_ref:      (TB, dim)            f32 VMEM  -- flattened image tile
    # lab_ref:    (TB, 1)              i32 VMEM  -- labels tile
    # w1_ref:     (dim, hidden)        f32 VMEM  -- image half of Linear1 (pre-transposed)
    # folded_ref: (n_classes, hidden)  f32 VMEM  -- embedding_table @ label-half-of-Linear1
    # w2_ref:     (1, hidden)          f32 VMEM  -- Linear2 weight as a row
    # o_ref:      (TB, 128)            f32 VMEM  -- sigmoid(logit) broadcast across lanes

    # Linear1 (image part) -> the only MXU op in the kernel, f32 accumulate.
    h = jnp.dot(x_ref[...], w1_ref[...], preferred_element_type=jnp.float32)

    # Embedding folded into Linear1:  h += (E @ W1_label.T)[labels].
    # n_classes is tiny for the moon problem, so a vectorized class-select on the
    # VPU (no gather, no extra MXU pass); static unroll over classes.
    lab = lab_ref[...]                                    # (TB, 1) int32
    n_classes = folded_ref.shape[0]
    for c in range(n_classes):
        sel = jnp.where(lab == c, 1.0, 0.0)               # (TB, 1)
        h = h + sel * folded_ref[pl.ds(c, 1), :]          # (TB,1) * (1,hidden) broadcast

    # LeakyReLU(0.2)
    h = jnp.where(h > 0, h, 0.2 * h)

    # Dropout(0.3) is identity in eval / inference mode.
    # TODO(synk): training-mode dropout (pltpu.prng_random_bits mask) not implemented.

    # Linear2 (hidden -> 1, no bias): an N=1 matmul would burn a full MXU pass at
    # <0.1% utilization, so do it as a lane reduction against the broadcast row.
    logits = jnp.sum(h * w2_ref[...], axis=-1, keepdims=True)      # (TB, 1)

    # Sigmoid: exp and approx reciprocal both ride the EUP slot (VALU stays free).
    sig = pl.reciprocal(1.0 + jnp.exp(-logits), approx=True)

    # Lane-dense store: broadcast the scalar-per-row result across 128 lanes so the
    # writeback is an unmasked full-vreg store; wrapper slices column 0.
    o_ref[...] = jnp.broadcast_to(sig, o_ref.shape).astype(o_ref.dtype)


def discriminator_moon_forward(img, labels, embedding_weight, w1, w2, *, block_b=512):
    """Forward pass of Discriminator_moon.

    img:              (B, dim) or (B, ...)        -- flattened to (B, dim)
    labels:           (B,) integer class ids
    embedding_weight: (n_classes, label_dim)      -- nn.Embedding weight
    w1:               (hidden, dim + label_dim)   -- nn.Linear(label_dim+dim, hidden, bias=False).weight
                                                     (columns [0:dim]=img, [dim:]=embedding, matching
                                                      the cat([img, emb]) order in the module)
    w2:               (1, hidden)                 -- nn.Linear(hidden, 1, bias=False).weight
    returns:          (B, 1) float32 in (0, 1)
    """
    B = img.shape[0]
    x = img.reshape(B, -1).astype(jnp.float32)
    dim = x.shape[1]
    hidden = w1.shape[0]
    n_classes = embedding_weight.shape[0]

    w1 = w1.astype(jnp.float32)
    # d_in @ W1.T = img @ W1[:, :dim].T + emb(labels) @ W1[:, dim:].T
    # and emb(labels) @ W1[:, dim:].T == (E @ W1[:, dim:].T)[labels]  -> fold once.
    w1_img_t = w1[:, :dim].T                                               # (dim, hidden)
    w1_emb_folded = embedding_weight.astype(jnp.float32) @ w1[:, dim:].T   # (n_classes, hidden)
    w2_row = w2.reshape(1, hidden).astype(jnp.float32)

    # Batch tiling: TB rows per grid step (multiple of 8 sublanes). The batch axis is
    # independent -> "parallel" so v7x can shard tiles across its two TensorCores.
    def _round_up(a, m):
        return (a + m - 1) // m * m

    tb = _round_up(min(block_b, _round_up(B, 8)), 8)
    b_pad = _round_up(B, tb)
    n_tiles = b_pad // tb

    if b_pad != B:
        x = jnp.pad(x, ((0, b_pad - B), (0, 0)))
        labels = jnp.pad(labels, (0, b_pad - B))
    lab2d = labels.reshape(b_pad, 1).astype(jnp.int32)

    out = pl.pallas_call(
        _disc_kernel,
        out_shape=jax.ShapeDtypeStruct((b_pad, _LANE), jnp.float32),
        grid_spec=pltpu.PrefetchScalarGridSpec(
            num_scalar_prefetch=0,
            grid=(n_tiles,),
            in_specs=[
                pl.BlockSpec((tb, dim), lambda i: (i, 0)),          # img tile
                pl.BlockSpec((tb, 1), lambda i: (i, 0)),            # labels tile
                pl.BlockSpec((dim, hidden), lambda i: (0, 0)),      # W1 (img half), replicated
                pl.BlockSpec((n_classes, hidden), lambda i: (0, 0)),# folded embedding, replicated
                pl.BlockSpec((1, hidden), lambda i: (0, 0)),        # W2 row, replicated
            ],
            out_specs=pl.BlockSpec((tb, _LANE), lambda i: (i, 0)),
        ),
        compiler_params=pltpu.CompilerParams(
            dimension_semantics=("parallel",)),
    )(x, lab2d, w1_img_t, w1_emb_folded, w2_row)

    return out[:B, :1]


if __name__ == "__main__":
    # Small "moon" style configuration (opt):
    n_classes = 2
    label_dim = 2
    dim = 2          # 2-D moon points -> img is (B, 2)
    hidden_dim = 32
    B = 8

    key = jax.random.PRNGKey(0)
    k_img, k_lab, k_emb, k_w1, k_w2 = jax.random.split(key, 5)

    img = jax.random.normal(k_img, (B, dim), dtype=jnp.float32)
    labels = jax.random.randint(k_lab, (B,), 0, n_classes, dtype=jnp.int32)

    # Deterministic parameter init (synthetic, not a checkpoint load).
    embedding_weight = jax.random.normal(k_emb, (n_classes, label_dim), dtype=jnp.float32)
    # nn.Linear(in, out, bias=False).weight is (out, in).
    w1 = (jax.random.normal(k_w1, (hidden_dim, label_dim + dim), dtype=jnp.float32)
          * (1.0 / jnp.sqrt(label_dim + dim)))
    w2 = (jax.random.normal(k_w2, (1, hidden_dim), dtype=jnp.float32)
          * (1.0 / jnp.sqrt(hidden_dim)))

    validity = discriminator_moon_forward(img, labels, embedding_weight, w1, w2)
    validity = jax.block_until_ready(validity)

    # Pure-JAX reference of the module's (eval-mode) forward pass.
    d_in = jnp.concatenate([img, jnp.take(embedding_weight, labels, axis=0)], axis=-1)
    pre = d_in @ w1.T
    h_ref = jnp.where(pre > 0, pre, 0.2 * pre)
    ref = jax.nn.sigmoid(h_ref @ w2.T)

    assert validity.shape == (B, 1)
    assert bool(jnp.allclose(validity, ref, atol=5e-3, rtol=0.0)), (
        f"max abs err = {float(jnp.max(jnp.abs(validity - ref)))}")
    print("KERNEL_OK")
</pallas_src>

<mosaic_0001>
module attributes {stable_mosaic.version = 11 : i64} {
  func.func @_disc_kernel(%arg0: i32, %arg1: memref<8x2xf32, #tpu.memory_space<vmem>>, %arg2: memref<8x1xi32, #tpu.memory_space<vmem>>, %arg3: memref<2x32xf32, #tpu.memory_space<vmem>>, %arg4: memref<2x32xf32, #tpu.memory_space<vmem>>, %arg5: memref<1x32xf32, #tpu.memory_space<vmem>>, %arg6: memref<8x128xf32, #tpu.memory_space<vmem>>) attributes {dimension_semantics = [#tpu.dimension_semantics<parallel>], iteration_bounds = array<i64: 1>, scalar_prefetch = 0 : i64, scratch_operands = 0 : i64, tpu.core_type = #tpu.core_type<tc>, window_params = [{transform_indices = @transform_0, window_bounds = array<i64: 8, 2>}, {transform_indices = @transform_1, window_bounds = array<i64: 8, 1>}, {pipeline_mode = #tpu.pipeline_mode<synchronous>, transform_indices = @transform_2, window_bounds = array<i64: 2, 32>}, {pipeline_mode = #tpu.pipeline_mode<synchronous>, transform_indices = @transform_3, window_bounds = array<i64: 2, 32>}, {pipeline_mode = #tpu.pipeline_mode<synchronous>, transform_indices = @transform_4, window_bounds = array<i64: 1, 32>}, {transform_indices = @transform_5, window_bounds = array<i64: 8, 128>}]} {
    %c0 = arith.constant 0 : index
    %c0_0 = arith.constant 0 : index
    %0 = vector.load %arg1[%c0, %c0_0] : memref<8x2xf32, #tpu.memory_space<vmem>>, vector<8x2xf32>
    %c0_1 = arith.constant 0 : index
    %c0_2 = arith.constant 0 : index
    %1 = vector.load %arg3[%c0_1, %c0_2] : memref<2x32xf32, #tpu.memory_space<vmem>>, vector<2x32xf32>
    %cst = arith.constant dense<0.000000e+00> : vector<8x32xf32>
    %2 = tpu.matmul %0, %1, %cst {dimension_numbers = #tpu.dot_dimension_numbers<[1], [0], [0], [1], [0, 0, 1, 1], [], []>} : vector<8x2xf32>, vector<2x32xf32>, vector<8x32xf32> -> vector<8x32xf32>
    %c0_3 = arith.constant 0 : index
    %c0_4 = arith.constant 0 : index
    %3 = vector.load %arg2[%c0_3, %c0_4] : memref<8x1xi32, #tpu.memory_space<vmem>>, vector<8x1xi32>
    %c0_i32 = arith.constant 0 : i32
    %4 = vector.broadcast %c0_i32 : i32 to vector<8x1xi32>
    %5 = arith.cmpi eq, %3, %4 : vector<8x1xi32>
    %cst_5 = arith.constant 1.000000e+00 : f32
    %cst_6 = arith.constant 0.000000e+00 : f32
    %6 = vector.broadcast %cst_5 : f32 to vector<8x1xf32>
    %7 = vector.broadcast %cst_6 : f32 to vector<8x1xf32>
    %8 = arith.select %5, %6, %7 : vector<8x1xi1>, vector<8x1xf32>
    %c0_7 = arith.constant 0 : index
    %c0_8 = arith.constant 0 : index
    %9 = vector.load %arg4[%c0_7, %c0_8] : memref<2x32xf32, #tpu.memory_space<vmem>>, vector<1x32xf32>
    %10 = vector.broadcast %8 : vector<8x1xf32> to vector<8x32xf32>
    %11 = vector.broadcast %9 : vector<1x32xf32> to vector<8x32xf32>
    %12 = arith.mulf %10, %11 : vector<8x32xf32>
    %13 = arith.addf %2, %12 : vector<8x32xf32>
    %c1_i32 = arith.constant 1 : i32
    %14 = vector.broadcast %c1_i32 : i32 to vector<8x1xi32>
    %15 = arith.cmpi eq, %3, %14 : vector<8x1xi32>
    %cst_9 = arith.constant 1.000000e+00 : f32
    %cst_10 = arith.constant 0.000000e+00 : f32
    %16 = vector.broadcast %cst_9 : f32 to vector<8x1xf32>
    %17 = vector.broadcast %cst_10 : f32 to vector<8x1xf32>
    %18 = arith.select %15, %16, %17 : vector<8x1xi1>, vector<8x1xf32>
    %c1 = arith.constant 1 : index
    %c0_11 = arith.constant 0 : index
    %19 = vector.load %arg4[%c1, %c0_11] : memref<2x32xf32, #tpu.memory_space<vmem>>, vector<1x32xf32>
    %20 = vector.broadcast %18 : vector<8x1xf32> to vector<8x32xf32>
    %21 = vector.broadcast %19 : vector<1x32xf32> to vector<8x32xf32>
    %22 = arith.mulf %20, %21 : vector<8x32xf32>
    %23 = arith.addf %13, %22 : vector<8x32xf32>
    %cst_12 = arith.constant 0.000000e+00 : f32
    %24 = vector.broadcast %cst_12 : f32 to vector<8x32xf32>
    %25 = arith.cmpf ogt, %23, %24 : vector<8x32xf32>
    %cst_13 = arith.constant 2.000000e-01 : f32
    %26 = vector.broadcast %cst_13 : f32 to vector<8x32xf32>
    %27 = arith.mulf %26, %23 : vector<8x32xf32>
    %28 = arith.select %25, %23, %27 : vector<8x32xi1>, vector<8x32xf32>
    %c0_14 = arith.constant 0 : index
    %c0_15 = arith.constant 0 : index
    %29 = vector.load %arg5[%c0_14, %c0_15] : memref<1x32xf32, #tpu.memory_space<vmem>>, vector<1x32xf32>
    %30 = vector.broadcast %29 : vector<1x32xf32> to vector<8x32xf32>
    %31 = arith.mulf %28, %30 : vector<8x32xf32>
    %cst_16 = arith.constant dense<0.000000e+00> : vector<8xf32>
    %32 = vector.multi_reduction <add>, %31, %cst_16 [1] : vector<8x32xf32> to vector<8xf32>
    %33 = vector.shape_cast %32 : vector<8xf32> to vector<8x1xf32>
    %cst_17 = arith.constant 0.000000e+00 : f32
    %34 = vector.broadcast %cst_17 : f32 to vector<8x1xf32>
    %35 = arith.subf %34, %33 : vector<8x1xf32>
    %36 = math.exp %35 : vector<8x1xf32>
    %cst_18 = arith.constant 1.000000e+00 : f32
    %37 = vector.broadcast %cst_18 : f32 to vector<8x1xf32>
    %38 = arith.addf %37, %36 : vector<8x1xf32>
    %39 = tpu.reciprocal %38 {approx = true} : vector<8x1xf32> -> vector<8x1xf32>
    %40 = vector.shape_cast %39 : vector<8x1xf32> to vector<8x1xf32>
    %41 = vector.broadcast %40 : vector<8x1xf32> to vector<8x128xf32>
    %c0_19 = arith.constant 0 : index
    %c0_20 = arith.constant 0 : index
    %42 = vector.load %arg6[%c0_19, %c0_20] : memref<8x128xf32, #tpu.memory_space<vmem>>, vector<8x128xf32>
    tpu.vector_store %arg6[%c0_19, %c0_20], %41 {strides = array<i32>} : memref<8x128xf32, #tpu.memory_space<vmem>>, vector<8x128xf32>,
    return
  }
  func.func @transform_0(%arg0: i32) -> (i32, i32) {
    %c0_i32 = arith.constant 0 : i32
    %c0_i32_0 = arith.constant 0 : i32
    return %arg0, %c0_i32 : i32, i32
  }
  func.func @transform_1(%arg0: i32) -> (i32, i32) {
    %c0_i32 = arith.constant 0 : i32
    %c0_i32_0 = arith.constant 0 : i32
    return %arg0, %c0_i32 : i32, i32
  }
  func.func @transform_2(%arg0: i32) -> (i32, i32) {
    %c0_i32 = arith.constant 0 : i32
    %c0_i32_0 = arith.constant 0 : i32
    %c0_i32_1 = arith.constant 0 : i32
    return %c0_i32, %c0_i32_0 : i32, i32
  }
  func.func @transform_3(%arg0: i32) -> (i32, i32) {
    %c0_i32 = arith.constant 0 : i32
    %c0_i32_0 = arith.constant 0 : i32
    %c0_i32_1 = arith.constant 0 : i32
    return %c0_i32, %c0_i32_0 : i32, i32
  }
  func.func @transform_4(%arg0: i32) -> (i32, i32) {
    %c0_i32 = arith.constant 0 : i32
    %c0_i32_0 = arith.constant 0 : i32
    %c0_i32_1 = arith.constant 0 : i32
    return %c0_i32, %c0_i32_0 : i32, i32
  }
  func.func @transform_5(%arg0: i32) -> (i32, i32) {
    %c0_i32 = arith.constant 0 : i32
    %c0_i32_0 = arith.constant 0 : i32
    return %arg0, %c0_i32 : i32, i32
  }
}

</mosaic_0001>

<bundles_post_ra>
// kernel: tpu_custom_call.1
= control target key start
LH: loop header
LB: loop body
LE: loop exit
PB: predicated region body
PF: predicated region fallthrough
CT: control target
= control target key end

     0   :  { %vm41_vm0 = vcmask 1041408   ;;  %v207_v2 = vmov 0.0   ;;  %vm208_vm1 = vmmov 0   ;;  %vm37_vm2 = vcmask 15360   ;;  %s262_s0 = inlined_call_operand.vmem [shape: f32[8,2], index: 0, kind: input, shape index: {}]   ;;  %s263_s1 = inlined_call_operand.vmem [shape: s32[8,1], index: 1, kind: input, shape index: {}]   ;;  %s264_s2 = inlined_call_operand.vmem [shape: f32[2,32], index: 2, kind: input, shape index: {}]   ;;  %s265_s3 = inlined_call_operand.vmem [shape: f32[2,32], index: 3, kind: input, shape index: {}]   ;;  %s266_s4 = inlined_call_operand.vmem [shape: f32[1,32], index: 4, kind: input, shape index: {}]   ;;  %s267_s5 = inlined_call_operand.hbm [shape: f32[8,128], index: 5, kind: output, shape index: {}]  }
   0x1   :  { %v22_v0 = vld [vmem:[%s264_s2] sm:$0x3]  ;;  %171 = vmatprep.subr.mxu0 %v207_v2  ;;  %173 = vmatprep.mubr.msk.f32.mxu0 %vm208_vm1, %v207_v2  ;;  %v209_v4 = vmov 0  }
   0x2   :  { %v21_v1 = vld [vmem:[%s262_s0] sm:$0xff]  ;;  %172 = vmatpush3.msk.msra.mxu0 %vm41_vm0, %v22_v0  ;;  %180 = vset.pattern.permute.xlu0 %v209_v4 }
   0x3   :  { %v23_v3 = vld [vmem:[%s263_s1] sm:$0xff] }
   0x4   :  { %vm24_vm3 = vcmp.eq.s32.totalorder %v23_v3, 0  ;;  %vm115_vm4 = vcmp.eq.s32.totalorder %v23_v3, 1 }
   0x5   :  { %10 = vsyncpa [#allocation3], 0  ;;  %174 = vmatmul.mubr.msk.f32.vlgmr.msra.gmra.mxu0 %vm37_vm2, %v21_v1  ;;  %v25_v5 = vsel %vm24_vm3, 1.0, %v207_v2  ;;  %v116_v6 = vsel %vm115_vm4, 1.0, %v207_v2  ;;  %v164_v8 = vld [vmem:[%s265_s3] ss:$0 sm:$0xff] }
   0x6   :  { %29 = vperm.xlu0 %180, %v25_v5   ;;  %v167_v9 = vld [vmem:[%s265_s3 + $0x1] ss:$0 sm:$0xff]  ;;  %v168_v18 = vld [vmem:[%s266_s4] ss:$0 sm:$0xff]  ;;  %vm140_vm6 = vcmask 261120   ;;  %s210_s3 = smov [#allocation2]  }
   0x7   :  { %s156_s27 = sshll.u32 %s210_s3, 4  ;;  %s157_s27 = int_to_ptr.vmem [resolvable:$true] %s156_s27 }
   0x8   :  { %s185_s28 = scalar_lea.vmem %s157_s27, 128  ;;  %p190_p1 = scmp.lt.s32.totalorder %s157_s27, %s157_s27 }
   0x9   :  { %p186_p0 = scmp.ne.s32.totalorder %s157_s27, %s185_s28  ;;  %p191_p2 = scmp.lt.s32.totalorder %s185_s28, %s185_s28 }
   0xa   :  { %120 = vperm.xlu0 %180, %v116_v6  }
   0xb   :  { %p192_p3 = por %p191_p2, %p190_p1 }
   0xd   :  { %p193_p4 = pnand %p192_p3, %p186_p0 }
  0x81   :  { %v30_v7 = vpop.permute.xlu0 %29 }
  0x82   :  { %v36_v11 = vmul.f32 %v164_v8, %v30_v7 }
  0x85   :  { %v121_v10 = vpop.permute.xlu0 %120 }
  0x86   :  { %v127_v13 = vmul.f32 %v167_v9, %v121_v10 }
  0xc5   :  { %v111_v12 = vpop.f32.mrf.mxu0 }
  0xc6   :  { %v112_v14 = vadd.f32 %v111_v12, %v36_v11 }
  0xc7   :  { %v175_v15 = vpop.f32.mrf.mxu0 }
  0xc8   :  { %v128_v16 = vadd.f32 %v127_v13, %v112_v14 }
  0xca   :  { %v130_v17 = vmul.f32 0.2, %v128_v16  ;;  %vm129_vm5 = vcmp.gt.f32.partialorder %v128_v16, 0.0 }
  0xcc   :  { %v131_v19 = vsel %vm129_vm5, %v128_v16, %v130_v17 }
  0xcd   :  { %v139_v20 = vmul.f32 %v168_v18, %v131_v19 }
  0xcf   :  { %v141_v21 = vsel %vm140_vm6, %v139_v20, 0.0 }
  0xd0   :  { %142 = vadd.xlane.f32.xlu1 %v141_v21 }
 0x159   :  { %v143_v22 = vpop.xlane.xlu1 %142 }
 0x15a   :  { %v144_v23 = vsub.f32 0.0, %v143_v22 }
 0x15c   :  { %v145_v24 = vmul.f32 1.442695, %v144_v23 }
 0x15e   :  { %181 = vpow2.f32 %v145_v24 }
 0x16b   :  { %v182_v25 = vpop.eup %181 }
 0x16c   :  { %v147_v26 = vadd.f32 1.0, %v182_v25 }
 0x16e   :  { %183 = vrcp.f32 %v147_v26 }
 0x17b   :  { %v184_v27 = vpop.eup %183 }
 0x17c   :  { %149 = vst [vmem:[#allocation2] sm:$0xff] %v184_v27 }
 0x17d   :  { %196 = shalt.err (!%p193_p4)
}
 0x17e   :  { %159 = dma.vmem_to_hbm [thread:$0]  %s157_s27, 128, %s267_s5, [#allocation3]  }
 0x17f   :  { %205 = dma.done.wait [#allocation3], 128  }
 0x180   :  { %206 = vsyncadd [#allocation3], 4294967168 }
 0x181   :  { %163 = vsyncpa [#allocation3], 1 }

</bundles_post_ra>
